<compile_context>
chip_gen: v7x
topology: tpu7x:2x2x1
jax: 0.10.0
libtpu: 0.0.40
codegen_flags: <defaults>
</compile_context>

<pallas_src>
import functools

import jax
import jax.numpy as jnp
from jax.experimental import pallas as pl
from jax.experimental.pallas import tpu as pltpu


def _cdiv(a: int, b: int) -> int:
    return -(-a // b)


def _round_up(a: int, b: int) -> int:
    return _cdiv(a, b) * b


def _lrp_avgpool_kernel(a_ref, r_ref, o_ref, *, toh, kh, ow, kw, inv_pool, eps):
    """One (batch, output-row block, channel block) tile.

    a_ref:   (toh*kh, W, Cb)  activations, native channels-last rows (W = ow*kw)
    r_ref:   (toh,    OW, Cb) incoming relevance per pooling window
    o_ref:   (toh*kh, W, Cb)  redistributed relevance, same layout as a_ref
    Channels sit on the lane axis; W is the (dense) sublane axis.
    """
    th, w, cb = a_ref.shape
    # Window split happens in-VMEM (one relayout copy, hidden under the HBM DMA).
    a5 = a_ref[...].astype(jnp.float32).reshape(toh, kh, ow, kw, cb)
    z = jnp.sum(a5, axis=(1, 3)) * inv_pool + eps            # (toh, ow, cb)
    # Exact divide: EUP/VPU are nowhere near the binding slot (HBM is).
    s = r_ref[...].astype(jnp.float32) * inv_pool / z        # (toh, ow, cb)
    o5 = a5 * s[:, None, :, None, :]                          # broadcast over the window
    o_ref[...] = o5.reshape(th, w, cb).astype(o_ref.dtype)


def lrp_avg_pool2d_nhwc(a: jax.Array, r: jax.Array, *, eps: float = 1e-5) -> jax.Array:
    """Copy-free channels-last entry point.

    a: (N, H, W, C) activations, r: (N, OH, OW, C) relevance -> (N, H, W, C).
    Assumes kernel_size == stride == (H//OH, W//OW) and no padding.
    """
    N, H, W, C = a.shape
    rN, OH, OW, rC = r.shape
    assert (rN, rC) == (N, C)
    assert H % OH == 0 and W % OW == 0, "pooling windows must tile the input exactly"
    kh, kw = H // OH, W // OW
    inv_pool = 1.0 / float(kh * kw)

    itemsize = jnp.dtype(a.dtype).itemsize
    budget = 4 * 1024 * 1024  # bytes per input tile; ~86% of HBM roofline per measured data

    def padded_row_bytes(cb):
        # VMEM footprint of one output-row worth of input with (8,128) padding.
        return kh * _round_up(W, 8) * _round_up(cb, 128) * itemsize

    # Prefer full-C tiles (contiguous HBM bursts); split C only when necessary.
    cands = [C] + [c for c in (512, 256, 128) if c < C and C % c == 0]
    cb, toh = C, 1  # fallback
    for cand in cands:
        t = budget // padded_row_bytes(cand)
        if t >= 1:
            cb, toh = cand, int(min(t, OH))
            break

    n_oh = _cdiv(OH, toh)
    n_c = _cdiv(C, cb)
    # v7x has 2 TensorCores: make sure the "parallel" grid has >= 2 steps when possible.
    if N * n_oh * n_c < 2 and OH >= 2:
        toh = _cdiv(OH, 2)
        n_oh = _cdiv(OH, toh)

    grid = (N, n_oh, n_c)
    kern = functools.partial(
        _lrp_avgpool_kernel,
        toh=toh, kh=kh, ow=OW, kw=kw, inv_pool=inv_pool, eps=float(eps))

    return pl.pallas_call(
        kern,
        out_shape=jax.ShapeDtypeStruct(a.shape, a.dtype),
        grid=grid,
        in_specs=[
            pl.BlockSpec((None, toh * kh, W, cb), lambda n, t, c: (n, t, 0, c)),
            pl.BlockSpec((None, toh, OW, cb), lambda n, t, c: (n, t, 0, c)),
        ],
        out_specs=pl.BlockSpec((None, toh * kh, W, cb), lambda n, t, c: (n, t, 0, c)),
        compiler_params=pltpu.CompilerParams(
            dimension_semantics=("parallel", "parallel", "parallel"),
            vmem_limit_bytes=48 * 1024 * 1024),
    )(a, r)


def relevance_filter(r: jax.Array, top_k_percent: float) -> jax.Array:
    """Plain-JAX equivalent of the PyTorch relevance_filter (runs on r, which is small)."""
    assert 0.0 < top_k_percent <= 1.0
    if top_k_percent >= 1.0:
        return r
    n = r.shape[0]
    flat = r.reshape(n, -1)
    k = max(1, int(top_k_percent * flat.shape[-1]))
    vals, idx = jax.lax.top_k(flat, k)
    out = jnp.zeros_like(flat).at[jnp.arange(n)[:, None], idx].set(vals)
    return out.reshape(r.shape)


def lrp_avg_pool2d(a: jax.Array, r: jax.Array, eps: float = 1e-5,
                   top_k: float = 0.0) -> jax.Array:
    """NCHW interface matching the PyTorch module.

    a: (N, C, H, W) activations, r: (N, C, OH, OW) relevance -> (N, C, H, W).
    """
    N, C, H, W = a.shape
    rN, rC, OH, OW = r.shape
    assert (rN, rC) == (N, C)
    assert H % OH == 0 and W % OW == 0, "pooling windows must tile the input exactly"
    if top_k:
        r = relevance_filter(r, top_k)
    # The only wrapper copies are the NCHW<->NHWC transposes (r is tiny).
    a_nhwc = jnp.transpose(a, (0, 2, 3, 1))
    r_nhwc = jnp.transpose(r, (0, 2, 3, 1))
    out = lrp_avg_pool2d_nhwc(a_nhwc, r_nhwc, eps=eps)
    return jnp.transpose(out, (0, 3, 1, 2))


def _reference(a, r, eps=1e-5):
    """Pure-JAX reference mirroring the PyTorch autograd computation."""
    N, C, H, W = a.shape
    OH, OW = r.shape[2], r.shape[3]
    kh, kw = H // OH, W // OW
    z = a.reshape(N, C, OH, kh, OW, kw).mean(axis=(3, 5)) + eps
    s = r / z
    c = jnp.repeat(jnp.repeat(s / (kh * kw), kh, axis=2), kw, axis=3)
    return a * c


if __name__ == "__main__":
    key = jax.random.PRNGKey(0)
    ka, kr, kb, ks, kc, kd = jax.random.split(key, 6)

    cases = [
        # AvgPool2d(kernel=8, stride=8): small channel count.
        (jax.random.uniform(ka, (2, 4, 16, 16), jnp.float32, 0.05, 1.0),
         jax.random.uniform(kr, (2, 4, 2, 2), jnp.float32, 0.0, 1.0)),
        # AvgPool2d(kernel=2, stride=2): exercises the kw < 8 window split.
        (jax.random.uniform(kb, (2, 32, 16, 16), jnp.float32, 0.05, 1.0),
         jax.random.uniform(ks, (2, 32, 8, 8), jnp.float32, 0.0, 1.0)),
        # AvgPool2d(kernel=4, stride=4): lane-dense channel path (C = 256).
        (jax.random.uniform(kc, (2, 256, 8, 8), jnp.float32, 0.05, 1.0),
         jax.random.uniform(kd, (2, 256, 2, 2), jnp.float32, 0.0, 1.0)),
    ]

    fn = jax.jit(functools.partial(lrp_avg_pool2d, eps=1e-5))

    for a, r in cases:
        out = jax.block_until_ready(fn(a, r))
        ref = _reference(a, r, eps=1e-5)
        assert out.shape == a.shape and out.dtype == a.dtype
        assert jnp.allclose(out, ref, rtol=1e-4, atol=1e-6), "mismatch vs reference"

    print("KERNEL_OK")
</pallas_src>

<mosaic_0001>
module attributes {stable_mosaic.version = 11 : i64} {
  func.func @_lrp_avgpool_kernel(%arg0: i32, %arg1: i32, %arg2: i32, %arg3: memref<1x16x16x4xf32, #tpu.memory_space<vmem>>, %arg4: memref<1x2x2x4xf32, #tpu.memory_space<vmem>>, %arg5: memref<1x16x16x4xf32, #tpu.memory_space<vmem>>) attributes {dimension_semantics = [#tpu.dimension_semantics<parallel>, #tpu.dimension_semantics<parallel>, #tpu.dimension_semantics<parallel>], iteration_bounds = array<i64: 2, 1, 1>, scalar_prefetch = 0 : i64, scratch_operands = 0 : i64, tpu.core_type = #tpu.core_type<tc>, window_params = [{transform_indices = @transform_0, window_bounds = array<i64: 1, 16, 16, 4>}, {transform_indices = @transform_1, window_bounds = array<i64: 1, 2, 2, 4>}, {transform_indices = @transform_2, window_bounds = array<i64: 1, 16, 16, 4>}]} {
    %c0 = arith.constant 0 : index
    %c0_0 = arith.constant 0 : index
    %c0_1 = arith.constant 0 : index
    %c0_2 = arith.constant 0 : index
    %0 = vector.load %arg3[%c0, %c0_0, %c0_1, %c0_2] : memref<1x16x16x4xf32, #tpu.memory_space<vmem>>, vector<1x16x16x4xf32>
    %1 = vector.shape_cast %0 : vector<1x16x16x4xf32> to vector<16x16x4xf32>
    %2 = vector.shape_cast %1 : vector<16x16x4xf32> to vector<2x8x2x8x4xf32>
    %cst = arith.constant dense<0.000000e+00> : vector<2x2x4xf32>
    %3 = vector.multi_reduction <add>, %2, %cst [1, 3] : vector<2x8x2x8x4xf32> to vector<2x2x4xf32>
    %cst_3 = arith.constant 1.562500e-02 : f32
    %4 = vector.broadcast %cst_3 : f32 to vector<2x2x4xf32>
    %5 = arith.mulf %3, %4 : vector<2x2x4xf32>
    %cst_4 = arith.constant 9.99999974E-6 : f32
    %6 = vector.broadcast %cst_4 : f32 to vector<2x2x4xf32>
    %7 = arith.addf %5, %6 : vector<2x2x4xf32>
    %c0_5 = arith.constant 0 : index
    %c0_6 = arith.constant 0 : index
    %c0_7 = arith.constant 0 : index
    %c0_8 = arith.constant 0 : index
    %8 = vector.load %arg4[%c0_5, %c0_6, %c0_7, %c0_8] : memref<1x2x2x4xf32, #tpu.memory_space<vmem>>, vector<1x2x2x4xf32>
    %9 = vector.shape_cast %8 : vector<1x2x2x4xf32> to vector<2x2x4xf32>
    %cst_9 = arith.constant 1.562500e-02 : f32
    %10 = vector.broadcast %cst_9 : f32 to vector<2x2x4xf32>
    %11 = arith.mulf %9, %10 : vector<2x2x4xf32>
    %12 = arith.divf %11, %7 : vector<2x2x4xf32>
    %13 = vector.shape_cast %12 : vector<2x2x4xf32> to vector<2x1x2x1x4xf32>
    %14 = vector.broadcast %13 : vector<2x1x2x1x4xf32> to vector<2x8x2x8x4xf32>
    %15 = arith.mulf %2, %14 : vector<2x8x2x8x4xf32>
    %16 = vector.shape_cast %15 : vector<2x8x2x8x4xf32> to vector<16x16x4xf32>
    %c0_10 = arith.constant 0 : index
    %c0_11 = arith.constant 0 : index
    %c0_12 = arith.constant 0 : index
    %c0_13 = arith.constant 0 : index
    %17 = vector.load %arg5[%c0_10, %c0_11, %c0_12, %c0_13] : memref<1x16x16x4xf32, #tpu.memory_space<vmem>>, vector<1x16x16x4xf32>
    %18 = vector.shape_cast %17 : vector<1x16x16x4xf32> to vector<16x16x4xf32>
    %19 = vector.shape_cast %16 : vector<16x16x4xf32> to vector<1x16x16x4xf32>
    tpu.vector_store %arg5[%c0_10, %c0_11, %c0_12, %c0_13], %19 {strides = array<i32>} : memref<1x16x16x4xf32, #tpu.memory_space<vmem>>, vector<1x16x16x4xf32>,
    return
  }
  func.func @transform_0(%arg0: i32, %arg1: i32, %arg2: i32) -> (i32, i32, i32, i32) {
    %c0_i32 = arith.constant 0 : i32
    %c0_i32_0 = arith.constant 0 : i32
    return %arg0, %arg1, %c0_i32, %arg2 : i32, i32, i32, i32
  }
  func.func @transform_1(%arg0: i32, %arg1: i32, %arg2: i32) -> (i32, i32, i32, i32) {
    %c0_i32 = arith.constant 0 : i32
    %c0_i32_0 = arith.constant 0 : i32
    return %arg0, %arg1, %c0_i32, %arg2 : i32, i32, i32, i32
  }
  func.func @transform_2(%arg0: i32, %arg1: i32, %arg2: i32) -> (i32, i32, i32, i32) {
    %c0_i32 = arith.constant 0 : i32
    %c0_i32_0 = arith.constant 0 : i32
    return %arg0, %arg1, %c0_i32, %arg2 : i32, i32, i32, i32
  }
}

</mosaic_0001>

<bundles_post_ra>
// kernel: lrp_avg_pool2d.1
= control target key start
LH: loop header
LB: loop body
LE: loop exit
PB: predicated region body
PF: predicated region fallthrough
CT: control target
= control target key end

     0   :  { %s751_s9 = smov 0   ;;  %s753_s10 = smov 0   ;;  %s1057_s0 = inlined_call_operand.vmem [shape: f32[2,16,16,4], index: 0, kind: input, shape index: {}]   ;;  %s1058_s1 = inlined_call_operand.vmem [shape: f32[2,2,2,4], index: 1, kind: input, shape index: {}]   ;;  %s1059_s2 = inlined_call_operand.vmem [shape: f32[2,16,16,4], index: 2, kind: output, shape index: {}]  }
   0x1   :  { %s755_s11 = smov 0  }
   0x2 LB: > { %s31_s12 = sadd.s32 1, %s729_s10  ;;  %p670_p0 = scmp.ge.s32.totalorder %s733_s11, 1  ;;  %s733_s11 = sphi %s755_s11, %s12_s11   ;;  %s729_s10 = sphi %s753_s10, %s1061_s10   ;;  %s725_s9 = sphi %s751_s9, %s1060_s9  }
   0x3   : > { %p33_p1 = scmp.ge.s32.totalorder %s31_s12, 2  ;;  %p170_p2 = scmp.lt.s32.totalorder %s733_s11, 3 }
   0x5   : > { %s1063_s12 = smov (%p33_p1, %s31_s12), 0  ;;  %p171_p3 = pnand %p670_p0, %p170_p2 }
   0x6   : > { %p221_p4 = scmp.lt.s32.totalorder (!%p171_p3), %s725_s9, 1  ;;  %vm293_vm0 = vcmask (!%p171_p3), 31744   ;;  %vm394_vm1 = vcmask (!%p171_p3), 1041409  }
   0x7   : > { %174 = sbr.rel (%p171_p3) target bundleno = 91 (0x5b), region = 28 }
   0xe   : > { %s1065_s9 = smov (!%p221_p4, %s725_s9), 1 }
   0xf   : > { %s679_s13 = sshll.u32 %s1065_s9, 8  ;;  %s680_s17 = sshll.u32 %s1065_s9, 2 }
  0x10   : > { %s777_s16 = scalar_lea.vmem %s1057_s0, %s679_s13  ;;  %s245_s20 = scalar_lea.vmem %s1058_s1, %s680_s17 }
  0x11   : > { %v780_v0 = vld [vmem:[%s777_s16] sm:$0xff]  ;;  %v783_v1 = vld [vmem:[%s777_s16 + $0x8] sm:$0xff]  ;;  %v786_v2 = vld [vmem:[%s777_s16 + $0x10] sm:$0xff]  ;;  %s950_s23 = scalar_lea.vmem %s1059_s2, %s679_s13 }
  0x12   : > { %v789_v3 = vld [vmem:[%s777_s16 + $0x18] sm:$0xff]  ;;  %v792_v4 = vld [vmem:[%s777_s16 + $0x20] sm:$0xff]  ;;  %v795_v5 = vld [vmem:[%s777_s16 + $0x28] sm:$0xff]  ;;  %v294_v6 = vsel %vm293_vm0, %v780_v0, 0.0  ;;  %v295_v7 = vsel %vm293_vm0, %v786_v2, 0.0  ;;  %v315_v8 = vsel %vm293_vm0, %v783_v1, 0.0 }
  0x13   : > { %v804_v9 = vld [vmem:[%s777_s16 + $0x30] sm:$0xff]  ;;  %v807_v10 = vld [vmem:[%s777_s16 + $0x38] sm:$0xff]  ;;  %v810_v11 = vld [vmem:[%s777_s16 + $0x40] sm:$0xff]  ;;  %v296_v12 = vadd.f32 %v295_v7, %v294_v6  ;;  %v297_v13 = vsel %vm293_vm0, %v792_v4, 0.0  ;;  %v316_v14 = vsel %vm293_vm0, %v789_v3, 0.0  ;;  %v318_v15 = vsel %vm293_vm0, %v795_v5, 0.0 }
  0x14   : > { %v819_v16 = vld [vmem:[%s777_s16 + $0x48] sm:$0xff]  ;;  %v822_v17 = vld [vmem:[%s777_s16 + $0x50] sm:$0xff]  ;;  %v825_v18 = vld [vmem:[%s777_s16 + $0x58] sm:$0xff]  ;;  %v299_v19 = vsel %vm293_vm0, %v804_v9, 0.0  ;;  %v317_v20 = vadd.f32 %v316_v14, %v315_v8  ;;  %v320_v23 = vsel %vm293_vm0, %v807_v10, 0.0  ;;  %v301_v26 = vsel %vm293_vm0, %v810_v11, 0.0 }
  0x15   : > { %v830_v21 = vld [vmem:[%s777_s16 + $0x60] sm:$0xff]  ;;  %v298_v22 = vadd.f32 %v297_v13, %v296_v12  ;;  %v835_v24 = vld [vmem:[%s777_s16 + $0x68] sm:$0xff]  ;;  %v838_v25 = vld [vmem:[%s777_s16 + $0x70] sm:$0xff]  ;;  %v303_v27 = vsel %vm293_vm0, %v822_v17, 0.0  ;;  %v322_v31 = vsel %vm293_vm0, %v819_v16, 0.0  ;;  %v324_v32 = vsel %vm293_vm0, %v825_v18, 0.0 }
  0x16   : > { %v319_v28 = vadd.f32 %v318_v15, %v317_v20  ;;  %v305_v30 = vsel %vm293_vm0, %v830_v21, 0.0  ;;  %v851_v33 = vld [vmem:[%s777_s16 + $0x80] sm:$0xff]  ;;  %v854_v34 = vld [vmem:[%s777_s16 + $0x88] sm:$0xff]  ;;  %v857_v35 = vld [vmem:[%s777_s16 + $0x90] sm:$0xff]  ;;  %v307_v50 = vsel %vm293_vm0, %v838_v25, 0.0  ;;  %v326_v57 = vsel %vm293_vm0, %v835_v24, 0.0 }
  0x17   : > { %v300_v29 = vadd.f32 %v299_v19, %v298_v22  ;;  %v860_v37 = vld [vmem:[%s777_s16 + $0x98] sm:$0xff]  ;;  %v863_v38 = vld [vmem:[%s777_s16 + $0xa0] sm:$0xff]  ;;  %v866_v39 = vld [vmem:[%s777_s16 + $0xa8] sm:$0xff]  ;;  %v336_v40 = vsel %vm293_vm0, %v851_v33, 0.0  ;;  %v337_v41 = vsel %vm293_vm0, %v857_v35, 0.0  ;;  %v357_v42 = vsel %vm293_vm0, %v854_v34, 0.0 }
  0x18   : > { %v321_v36 = vadd.f32 %v320_v23, %v319_v28  ;;  %v875_v43 = vld [vmem:[%s777_s16 + $0x78] sm:$0xff]  ;;  %v878_v45 = vld [vmem:[%s777_s16 + $0xb0] sm:$0xff]  ;;  %v881_v46 = vld [vmem:[%s777_s16 + $0xc0] sm:$0xff]  ;;  %v338_v47 = vadd.f32 %v337_v41, %v336_v40  ;;  %v339_v48 = vsel %vm293_vm0, %v863_v38, 0.0  ;;  %v358_v49 = vsel %vm293_vm0, %v860_v37, 0.0 }
  0x19   : > { %v302_v44 = vadd.f32 %v301_v26, %v300_v29  ;;  %v890_v52 = vld [vmem:[%s777_s16 + $0xb8] sm:$0xff]  ;;  %v893_v53 = vld [vmem:[%s777_s16 + $0xc8] sm:$0xff]  ;;  %v341_v54 = vsel %vm293_vm0, %v878_v45, 0.0  ;;  %v359_v55 = vadd.f32 %v358_v49, %v357_v42  ;;  %v900_v58 = vld [vmem:[%s777_s16 + $0xd0] sm:$0xff]  ;;  %v360_v60 = vsel %vm293_vm0, %v866_v39, 0.0 }
  0x1a   : > { %v323_v51 = vadd.f32 %v322_v31, %v321_v36  ;;  %v340_v59 = vadd.f32 %v339_v48, %v338_v47  ;;  %v328_v62 = vsel %vm293_vm0, %v875_v43, 0.0  ;;  %v907_v63 = vld [vmem:[%s777_s16 + $0xd8] sm:$0xff]  ;;  %v343_v6 = vsel %vm293_vm0, %v881_v46, 0.0  ;;  %v912_v12 = vld [vmem:[%s777_s16 + $0xe0] sm:$0xff]  ;;  %v919_v20 = vld [vmem:[%s777_s16 + $0xe8] sm:$0xff] }
  0x1b   : > { %v304_v56 = vadd.f32 %v303_v27, %v302_v44  ;;  %v361_v7 = vadd.f32 %v360_v60, %v359_v55  ;;  %v362_v14 = vsel %vm293_vm0, %v890_v52, 0.0  ;;  %v364_v15 = vsel %vm293_vm0, %v893_v53, 0.0  ;;  %v924_v27 = vld [vmem:[%s777_s16 + $0xf0] sm:$0xff]  ;;  %v929_v31 = vld [vmem:[%s777_s16 + $0xf8] sm:$0xff] }
  0x1c   : > { %v325_v61 = vadd.f32 %v324_v32, %v323_v51  ;;  %v342_v13 = vadd.f32 %v341_v54, %v340_v59  ;;  %v345_v22 = vsel %vm293_vm0, %v900_v58, 0.0  ;;  %v366_v29 = vsel %vm293_vm0, %v907_v63, 0.0 }
  0x1d   : > { %v306_v8 = vadd.f32 %v305_v30, %v304_v56  ;;  %v363_v23 = vadd.f32 %v362_v14, %v361_v7  ;;  %v347_v32 = vsel %vm293_vm0, %v912_v12, 0.0  ;;  %v368_v42 = vsel %vm293_vm0, %v919_v20, 0.0 }
  0x1e   : > { %v327_v19 = vadd.f32 %v326_v57, %v325_v61  ;;  %v344_v28 = vadd.f32 %v343_v6, %v342_v13  ;;  %v349_v47 = vsel %vm293_vm0, %v924_v27, 0.0  ;;  %v370_v51 = vsel %vm293_vm0, %v929_v31, 0.0 }
  0x1f   : > { %v308_v26 = vadd.f32 %v307_v50, %v306_v8  ;;  %v365_v36 = vadd.f32 %v364_v15, %v363_v23 }
  0x20   : > { %v329_v30 = vadd.f32 %v328_v62, %v327_v19  ;;  %v346_v41 = vadd.f32 %v345_v22, %v344_v28 }
  0x21   : > { %v309_v40 = vrot.slane %v308_v26, 4  ;;  %v367_v48 = vadd.f32 %v366_v29, %v365_v36 }
  0x22   : > { %v330_v44 = vrot.slane %v329_v30, 4  ;;  %v348_v50 = vadd.f32 %v347_v32, %v346_v41 }
  0x23   : > { %v310_v49 = vadd.f32 %v309_v40, %v308_v26  ;;  %v369_v55 = vadd.f32 %v368_v42, %v367_v48 }
  0x24   : > { %v331_v54 = vadd.f32 %v330_v44, %v329_v30  ;;  %v350_v57 = vadd.f32 %v349_v47, %v348_v50  ;;  %v735_v50 = vmov 1966171168  }
  0x25   : > { %v311_v56 = vrot.slane %v310_v49, 2  ;;  %v371_v60 = vadd.f32 %v370_v51, %v369_v55  ;;  %v406_v51 = vunpack.c.l.s4 %v735_v50 }
  0x26   : > { %v332_v59 = vrot.slane %v331_v54, 2  ;;  %v351_v62 = vrot.slane %v350_v57, 4 }
  0x27   : > { %v312_v61 = vadd.f32 %v311_v56, %v310_v49  ;;  %v372_v7 = vrot.slane %v371_v60, 4 }
  0x28   : > { %v333_v6 = vadd.f32 %v332_v59, %v331_v54  ;;  %v352_v13 = vadd.f32 %v351_v62, %v350_v57  ;;  %v408_v54 = vlaneseq  ;;  %v386_v59 = vld [vmem:[%s245_s20] sm:$0x3] }
  0x29   : > { %v313_v8 = vrot.slane %v312_v61, 1  ;;  %v373_v15 = vadd.f32 %v372_v7, %v371_v60  ;;  %v407_v60 = vunpack.c.0.s8 %v406_v51 }
  0x2a   : > { %v334_v14 = vrot.slane %v333_v6, 1  ;;  %v353_v22 = vrot.slane %v352_v13, 2 }
  0x2b   : > { %v314_v19 = vadd.f32 %v313_v8, %v312_v61  ;;  %v374_v26 = vrot.slane %v373_v15, 2  ;;  %v409_v61 = vshrl.u32 %v408_v54, 7 }
  0x2c   : > { %v335_v23 = vadd.f32 %v334_v14, %v333_v6  ;;  %v354_v29 = vadd.f32 %v353_v22, %v352_v13  ;;  %v388_v6 = vmul.f32 0.015625, %v386_v59  ;;  %v387_v14 = vld [vmem:[%s245_s20 + $0x2] sm:$0x3] }
  0x2d   : > { %v378_v28 = vmul.f32 0.015625, %v314_v19  ;;  %v375_v32 = vadd.f32 %v374_v26, %v373_v15  ;;  %v410_v7 = vsub.s32 %v407_v60, %v409_v61  ;;  %v451_v19 = vsub.s32 0, %v409_v61 }
  0x2e   : > { %v379_v30 = vmul.f32 0.015625, %v335_v23  ;;  %v355_v40 = vrot.slane %v354_v29, 1  ;;  %v389_v22 = vmul.f32 0.015625, %v387_v14 }
  0x2f   : > { %v382_v36 = vadd.f32 1e-05, %v378_v28  ;;  %v376_v42 = vrot.slane %v375_v32, 1 }
  0x30   : > { %v383_v41 = vadd.f32 1e-05, %v379_v30  ;;  %v356_v44 = vadd.f32 %v355_v40, %v354_v29 }
  0x31   : > { %v377_v48 = vadd.f32 %v376_v42, %v375_v32 }
  0x32   : > { %v395_v47 = vsel %vm394_vm1, %v383_v41, %v382_v36  ;;  %v380_v49 = vmul.f32 0.015625, %v356_v44 }
  0x33   : > { %707 = vrcp.f32 %v395_v47  ;;  %v381_v55 = vmul.f32 0.015625, %v377_v48 }
  0x34   : > { %v384_v56 = vadd.f32 1e-05, %v380_v49 }
  0x35   : > { %v385_v57 = vadd.f32 1e-05, %v381_v55 }
  0x37   : > { %v396_v62 = vsel %vm394_vm1, %v385_v57, %v384_v56 }
  0x38   : > { %709 = vrcp.f32 %v396_v62 }
  0x3d   : > { %v708_v8 = vpop.eup %707 }
  0x3e   : > { %v400_v13 = vmul.f32 %v708_v8, %v388_v6 }
  0x40   : > { %v411_v15 = vrot.slane %v400_v13, %v410_v7 }
  0x42   : > { %v419_v23 = vrot.slane %v411_v15, %v410_v7  ;;  %v412_v26 = vcombine.high %v411_v15, %v411_v15  ;;  %v710_v28 = vpop.eup %709 }
  0x43   : > { %v402_v32 = vmul.f32 %v710_v28, %v389_v22 }
  0x44   : > { %v452_v29 = vrot.slane %v419_v23, %v451_v19  ;;  %v426_v30 = vrot.slane %v412_v26, %v410_v7 }
  0x46   : > { %v469_v36 = vmul.f32 %v452_v29, %v780_v0  ;;  %v456_v40 = vrot.slane %v426_v30, %v451_v19  ;;  %v471_v41 = vmul.f32 %v452_v29, %v786_v2  ;;  %v473_v42 = vmul.f32 %v452_v29, %v792_v4 }
  0x47   : > { %v475_v44 = vmul.f32 %v452_v29, %v804_v9  ;;  %v477_v47 = vmul.f32 %v452_v29, %v810_v11  ;;  %v479_v48 = vmul.f32 %v452_v29, %v822_v17  ;;  %v481_v49 = vmul.f32 %v452_v29, %v830_v21 }
  0x48   : > { %501 = vst.msk [vmem:[%s950_s23] sm:$0xff] %vm293_vm0, %v469_v36  ;;  %v470_v0 = vmul.f32 %v456_v40, %v783_v1  ;;  %503 = vst.msk [vmem:[%s950_s23 + $0x10] sm:$0xff] %vm293_vm0, %v471_v41  ;;  %v472_v2 = vmul.f32 %v456_v40, %v789_v3  ;;  %v474_v4 = vmul.f32 %v456_v40, %v795_v5 }
  0x49   : > { %505 = vst.msk [vmem:[%s950_s23 + $0x20] sm:$0xff] %vm293_vm0, %v473_v42  ;;  %v476_v9 = vmul.f32 %v456_v40, %v807_v10  ;;  %507 = vst.msk [vmem:[%s950_s23 + $0x30] sm:$0xff] %vm293_vm0, %v475_v44  ;;  %v478_v1 = vmul.f32 %v456_v40, %v819_v16  ;;  %v480_v3 = vmul.f32 %v456_v40, %v825_v18 }
  0x4a   : > { %509 = vst.msk [vmem:[%s950_s23 + $0x40] sm:$0xff] %vm293_vm0, %v477_v47  ;;  %511 = vst.msk [vmem:[%s950_s23 + $0x50] sm:$0xff] %vm293_vm0, %v479_v48  ;;  %v482_v5 = vmul.f32 %v456_v40, %v835_v24  ;;  %v483_v10 = vmul.f32 %v452_v29, %v838_v25  ;;  %v484_v11 = vmul.f32 %v456_v40, %v875_v43 }
  0x4b   : > { %513 = vst.msk [vmem:[%s950_s23 + $0x60] sm:$0xff] %vm293_vm0, %v481_v49  ;;  %502 = vst.msk [vmem:[%s950_s23 + $0x8] sm:$0xff] %vm293_vm0, %v470_v0  ;;  %v433_v16 = vrot.slane %v402_v32, %v410_v7 }
  0x4c   : > { %504 = vst.msk [vmem:[%s950_s23 + $0x18] sm:$0xff] %vm293_vm0, %v472_v2  ;;  %506 = vst.msk [vmem:[%s950_s23 + $0x28] sm:$0xff] %vm293_vm0, %v474_v4 }
  0x4d   : > { %508 = vst.msk [vmem:[%s950_s23 + $0x38] sm:$0xff] %vm293_vm0, %v476_v9  ;;  %510 = vst.msk [vmem:[%s950_s23 + $0x48] sm:$0xff] %vm293_vm0, %v478_v1  ;;  %v441_v17 = vrot.slane %v433_v16, %v410_v7  ;;  %v434_v18 = vcombine.high %v433_v16, %v433_v16 }
  0x4e   : > { %512 = vst.msk [vmem:[%s950_s23 + $0x58] sm:$0xff] %vm293_vm0, %v480_v3  ;;  %514 = vst.msk [vmem:[%s950_s23 + $0x68] sm:$0xff] %vm293_vm0, %v482_v5 }
  0x4f   : > { %515 = vst.msk [vmem:[%s950_s23 + $0x70] sm:$0xff] %vm293_vm0, %v483_v10  ;;  %516 = vst.msk [vmem:[%s950_s23 + $0x78] sm:$0xff] %vm293_vm0, %v484_v11  ;;  %v460_v21 = vrot.slane %v441_v17, %v451_v19  ;;  %v448_v24 = vrot.slane %v434_v18, %v410_v7 }
  0x51   : > { %v485_v25 = vmul.f32 %v460_v21, %v851_v33  ;;  %v464_v43 = vrot.slane %v448_v24, %v451_v19  ;;  %v487_v50 = vmul.f32 %v460_v21, %v857_v35  ;;  %v489_v51 = vmul.f32 %v460_v21, %v863_v38 }
  0x52   : > { %v491_v54 = vmul.f32 %v460_v21, %v878_v45  ;;  %v493_v55 = vmul.f32 %v460_v21, %v881_v46  ;;  %v495_v56 = vmul.f32 %v460_v21, %v900_v58  ;;  %v497_v57 = vmul.f32 %v460_v21, %v912_v12 }
  0x53   : > { %517 = vst.msk [vmem:[%s950_s23 + $0x80] sm:$0xff] %vm293_vm0, %v485_v25  ;;  %v486_v33 = vmul.f32 %v464_v43, %v854_v34  ;;  %519 = vst.msk [vmem:[%s950_s23 + $0x90] sm:$0xff] %vm293_vm0, %v487_v50  ;;  %v488_v35 = vmul.f32 %v464_v43, %v860_v37  ;;  %v490_v38 = vmul.f32 %v464_v43, %v866_v39 }
  0x54   : > { %521 = vst.msk [vmem:[%s950_s23 + $0xa0] sm:$0xff] %vm293_vm0, %v489_v51  ;;  %v492_v45 = vmul.f32 %v464_v43, %v890_v52  ;;  %523 = vst.msk [vmem:[%s950_s23 + $0xb0] sm:$0xff] %vm293_vm0, %v491_v54  ;;  %v494_v34 = vmul.f32 %v464_v43, %v893_v53  ;;  %v496_v37 = vmul.f32 %v464_v43, %v907_v63 }
  0x55   : > { %525 = vst.msk [vmem:[%s950_s23 + $0xc0] sm:$0xff] %vm293_vm0, %v493_v55  ;;  %527 = vst.msk [vmem:[%s950_s23 + $0xd0] sm:$0xff] %vm293_vm0, %v495_v56  ;;  %v498_v39 = vmul.f32 %v464_v43, %v919_v20  ;;  %v499_v46 = vmul.f32 %v460_v21, %v924_v27  ;;  %v500_v52 = vmul.f32 %v464_v43, %v929_v31 }
  0x56   : > { %529 = vst.msk [vmem:[%s950_s23 + $0xe0] sm:$0xff] %vm293_vm0, %v497_v57  ;;  %518 = vst.msk [vmem:[%s950_s23 + $0x88] sm:$0xff] %vm293_vm0, %v486_v33 }
  0x57   : > { %520 = vst.msk [vmem:[%s950_s23 + $0x98] sm:$0xff] %vm293_vm0, %v488_v35  ;;  %522 = vst.msk [vmem:[%s950_s23 + $0xa8] sm:$0xff] %vm293_vm0, %v490_v38 }
  0x58   : > { %524 = vst.msk [vmem:[%s950_s23 + $0xb8] sm:$0xff] %vm293_vm0, %v492_v45  ;;  %526 = vst.msk [vmem:[%s950_s23 + $0xc8] sm:$0xff] %vm293_vm0, %v494_v34 }
  0x59   : > { %528 = vst.msk [vmem:[%s950_s23 + $0xd8] sm:$0xff] %vm293_vm0, %v496_v37  ;;  %530 = vst.msk [vmem:[%s950_s23 + $0xe8] sm:$0xff] %vm293_vm0, %v498_v39 }
  0x5a   : > { %531 = vst.msk [vmem:[%s950_s23 + $0xf0] sm:$0xff] %vm293_vm0, %v499_v46  ;;  %532 = vst.msk [vmem:[%s950_s23 + $0xf8] sm:$0xff] %vm293_vm0, %v500_v52 }
  0x5b PF: > { %s12_s11 = sadd.s32 1, %s733_s11   ;;  %s1060_s9 = smov %s729_s10 }
  0x5c   : > { %p9_p5 = scmp.ge.s32.totalorder %s12_s11, 4   ;;  %s1061_s10 = smov %s1063_s12 }
  0x5e   :  { %11 = sbr.rel (!%p9_p5) target bundleno = 2 (0x2), region = 61 }

</bundles_post_ra>
